<compile_context>
chip_gen: v6e
topology: v6e:2x2x1
jax: 0.10.0
libtpu: 0.0.40
codegen_flags: <defaults>
</compile_context>

<pallas_src>
import functools

import jax
import jax.numpy as jnp
from jax.experimental import pallas as pl
from jax.experimental.pallas import tpu as pltpu

B_TILE = 8  # sublane-aligned batch tile


def _fused_lstm_head_kernel(x_ref, w_ref, wlin_ref, o_ref, *,
                            seq, e_pad, hidden):
    """One batch tile of the whole forward pass.

    x_ref:    (T*B_TILE, E_pad) time-major rows (row t*B_TILE + b), columns are
              [E features | 1.0 bias column | zero pad]
    w_ref:    (E_pad + H, 4H)   rows 0:E_pad  -> input proj weight (+ bias row + pad)
                                rows E_pad:   -> hidden->hidden weight
              g-gate columns (2H:3H) of both sections pre-scaled by 2.
    wlin_ref: (2H + 1, 1)       head weight (rows 0:H 'regular', H:2H 'reverse',
                                last row = head bias)
    o_ref:    (B_TILE, 1)       logits for this batch tile
    """
    T, H, E1 = seq, hidden, e_pad

    w_ih = w_ref[0:E1, :]            # (E_pad, 4H) -- includes folded bias row
    whh = w_ref[E1:E1 + H, :]        # (H, 4H), loaded once (8-row aligned slice)

    # Hoisted, time-invariant input projection: one lane-dense MXU matmul for
    # all timesteps (bias comes in via the ones column of x).
    gates_in = jnp.dot(x_ref[...], w_ih,
                       preferred_element_type=jnp.float32)   # (T*B_TILE, 4H)

    def cell(g_in, h_prev, c_prev):
        # Per-step critical path: recurrent matmul + ONE full-vreg sigmoid.
        gates = g_in + jnp.dot(h_prev, whh,
                               preferred_element_type=jnp.float32)  # (B_TILE, 4H)
        s = jax.nn.sigmoid(gates)                 # single EUP push for all 4 gates
        i_g = s[:, 0 * H:1 * H]
        f_g = s[:, 1 * H:2 * H]
        # g pre-activations were doubled at init: 2*sigmoid(2x) - 1 == tanh(x).
        g_g = 2.0 * s[:, 2 * H:3 * H] - 1.0
        o_g = s[:, 3 * H:4 * H]
        c_new = f_g * c_prev + i_g * g_g
        h_new = o_g * jnp.tanh(c_new)
        return h_new, c_new

    h = jnp.zeros((B_TILE, H), jnp.float32)
    c = jnp.zeros((B_TILE, H), jnp.float32)

    # t = 0: capture h for the head's "reverse" feature (forward h at step 0).
    h, c = cell(gates_in[0:B_TILE, :], h, c)
    h_first = h
    # Remaining timesteps: static unroll (T small & known at trace time); every
    # gates_in slice starts on an 8-sublane boundary thanks to batch padding.
    # TODO(synk): for T >~ 64 switch to lax.fori_loop(..., unroll=8) with
    # pl.ds(pl.multiple_of(t * B_TILE, B_TILE), B_TILE) indexing.
    for t in range(1, T):
        h, c = cell(gates_in[t * B_TILE:(t + 1) * B_TILE, :], h, c)
    h_last = h

    # Fused Linear(2H -> 1) head; split the weight instead of concatenating the
    # two H-wide features along the lane axis. Bias is the last packed row.
    o_ref[...] = (jnp.dot(h_last, wlin_ref[0:H, :],
                          preferred_element_type=jnp.float32)
                  + jnp.dot(h_first, wlin_ref[H:2 * H, :],
                            preferred_element_type=jnp.float32)
                  + wlin_ref[2 * H:2 * H + 1, :])


def lstm_sentiment_forward(text, params):
    """text: (B, T, E) float32, batch-first.  Returns (B, 1) float32 logits."""
    B, T, E = text.shape
    H = params["hidden_dim"]
    E_pad = params["e_pad"]

    B_pad = ((B + B_TILE - 1) // B_TILE) * B_TILE
    n_tiles = B_pad // B_TILE

    # Layout prep (tiny XLA ops): pad batch to a multiple of 8, go time-major,
    # append the constant-1 bias column + zero pad so E_pad is 8-row aligned
    # against the packed weight, and group batch tiles on the leading axis.
    x = jnp.pad(text, ((0, B_pad - B), (0, 0), (0, 0)))          # (B_pad, T, E)
    x = jnp.transpose(x, (1, 0, 2))                              # (T, B_pad, E)
    ones = jnp.ones((T, B_pad, 1), jnp.float32)
    zpad = jnp.zeros((T, B_pad, E_pad - E - 1), jnp.float32)
    x = jnp.concatenate([x, ones, zpad], axis=-1)                # (T, B_pad, E_pad)
    x = (x.reshape(T, n_tiles, B_TILE, E_pad)
          .transpose(1, 0, 2, 3)
          .reshape(n_tiles, T * B_TILE, E_pad))                  # (n_tiles, T*8, E_pad)

    kernel = functools.partial(_fused_lstm_head_kernel,
                               seq=T, e_pad=E_pad, hidden=H)

    # TODO(synk): if T/B/H are ever scaled far up, block gates_in over time
    # ("arbitrary" axis) or set vmem_limit_bytes so the (T*B_pad, 4H) f32
    # intermediate stays under v7x's 32 MiB scoped VMEM.
    out = pl.pallas_call(
        kernel,
        out_shape=jax.ShapeDtypeStruct((n_tiles, B_TILE, 1), jnp.float32),
        grid=(n_tiles,),
        in_specs=[
            pl.BlockSpec((None, T * B_TILE, E_pad), lambda g: (g, 0, 0)),
            pl.BlockSpec((E_pad + H, 4 * H), lambda g: (0, 0)),
            pl.BlockSpec((2 * H + 1, 1), lambda g: (0, 0)),
        ],
        out_specs=pl.BlockSpec((None, B_TILE, 1), lambda g: (g, 0, 0)),
        compiler_params=pltpu.CompilerParams(
            dimension_semantics=("parallel",)),
    )(x, params["w_big"], params["w_head"])

    return out.reshape(B_pad, 1)[:B]


def init_params(key, embedding_dim, hidden_dim):
    """Deterministic init matching PyTorch parameter shapes, then packed.

    Only the forward-direction LSTM weights + the linear head are kept: the
    reverse-direction weights of the bidirectional nn.LSTM are dead w.r.t.
    this module's forward() output.
    """
    E, H = embedding_dim, hidden_dim
    E_pad = ((E + 1 + 7) // 8) * 8          # E features + 1 bias column, 8-row aligned
    bound = 1.0 / jnp.sqrt(jnp.float32(H))
    ks = jax.random.split(key, 6)
    u = lambda k, shape: jax.random.uniform(
        k, shape, jnp.float32, minval=-bound, maxval=bound)

    # torch layout: weight_ih (4H, E), weight_hh (4H, H), biases (4H,), gate order i,f,g,o
    w_ih = u(ks[0], (4 * H, E))
    w_hh = u(ks[1], (4 * H, H))
    b = u(ks[2], (4 * H,)) + u(ks[3], (4 * H,))            # b_ih + b_hh

    lin_bound = 1.0 / jnp.sqrt(jnp.float32(2 * H))
    w_lin = jax.random.uniform(ks[4], (1, 2 * H), jnp.float32,
                               minval=-lin_bound, maxval=lin_bound)
    b_lin = jax.random.uniform(ks[5], (1,), jnp.float32,
                               minval=-lin_bound, maxval=lin_bound)

    # Pre-transpose so 4H sits on the 128-lane axis; pre-scale the g-gate
    # columns by 2 so one in-kernel sigmoid yields tanh via 2*sigmoid(2x)-1.
    gate_scale = jnp.concatenate(
        [jnp.ones((2 * H,)), 2.0 * jnp.ones((H,)), jnp.ones((H,))]
    ).astype(jnp.float32)                                   # (4H,)
    w_ih_t = jnp.transpose(w_ih) * gate_scale               # (E, 4H)
    w_hh_t = jnp.transpose(w_hh) * gate_scale               # (H, 4H)
    b_row = (b * gate_scale).reshape(1, 4 * H)              # (1, 4H)
    pad_rows = jnp.zeros((E_pad - E - 1, 4 * H), jnp.float32)

    # One packed weight buffer: [w_ih | bias row | zero pad | w_hh] (rows).
    w_big = jnp.concatenate([w_ih_t, b_row, pad_rows, w_hh_t], axis=0)  # (E_pad+H, 4H)
    # One packed head buffer: [w_lin^T | b_lin] (rows).
    w_head = jnp.concatenate([jnp.transpose(w_lin), b_lin.reshape(1, 1)],
                             axis=0)                        # (2H+1, 1)

    return {
        "hidden_dim": H,
        "e_pad": E_pad,
        "w_big": w_big,
        "w_head": w_head,
    }


if __name__ == "__main__":
    B, T, E, H = 2, 8, 16, 32
    key = jax.random.PRNGKey(0)
    k_param, k_x = jax.random.split(key)

    params = init_params(k_param, embedding_dim=E, hidden_dim=H)
    text = jax.random.normal(k_x, (B, T, E), dtype=jnp.float32)

    fwd = jax.jit(functools.partial(lstm_sentiment_forward, params=params))
    out = jax.block_until_ready(fwd(text))
    assert out.shape == (B, 1) and out.dtype == jnp.float32
    print("KERNEL_OK")
</pallas_src>

<mosaic_0001>
module attributes {stable_mosaic.version = 11 : i64} {
  func.func @_fused_lstm_head_kernel(%arg0: i32, %arg1: memref<1x64x24xf32, #tpu.memory_space<vmem>>, %arg2: memref<56x128xf32, #tpu.memory_space<vmem>>, %arg3: memref<65x1xf32, #tpu.memory_space<vmem>>, %arg4: memref<1x8x1xf32, #tpu.memory_space<vmem>>) attributes {dimension_semantics = [#tpu.dimension_semantics<parallel>], iteration_bounds = array<i64: 1>, scalar_prefetch = 0 : i64, scratch_operands = 0 : i64, tpu.core_type = #tpu.core_type<tc>, window_params = [{transform_indices = @transform_0, window_bounds = array<i64: 1, 64, 24>}, {pipeline_mode = #tpu.pipeline_mode<synchronous>, transform_indices = @transform_1, window_bounds = array<i64: 56, 128>}, {pipeline_mode = #tpu.pipeline_mode<synchronous>, transform_indices = @transform_2, window_bounds = array<i64: 65, 1>}, {transform_indices = @transform_3, window_bounds = array<i64: 1, 8, 1>}]} {
    %c0 = arith.constant 0 : index
    %c0_0 = arith.constant 0 : index
    %0 = vector.load %arg2[%c0, %c0_0] : memref<56x128xf32, #tpu.memory_space<vmem>>, vector<24x128xf32>
    %c24 = arith.constant 24 : index
    %c0_1 = arith.constant 0 : index
    %1 = vector.load %arg2[%c24, %c0_1] : memref<56x128xf32, #tpu.memory_space<vmem>>, vector<32x128xf32>
    %c0_2 = arith.constant 0 : index
    %c0_3 = arith.constant 0 : index
    %c0_4 = arith.constant 0 : index
    %2 = vector.load %arg1[%c0_2, %c0_3, %c0_4] : memref<1x64x24xf32, #tpu.memory_space<vmem>>, vector<1x64x24xf32>
    %3 = vector.shape_cast %2 : vector<1x64x24xf32> to vector<64x24xf32>
    %cst = arith.constant dense<0.000000e+00> : vector<64x128xf32>
    %4 = tpu.matmul %3, %0, %cst {dimension_numbers = #tpu.dot_dimension_numbers<[1], [0], [0], [1], [0, 0, 1, 1], [], []>} : vector<64x24xf32>, vector<24x128xf32>, vector<64x128xf32> -> vector<64x128xf32>
    %cst_5 = arith.constant 0.000000e+00 : f32
    %5 = vector.broadcast %cst_5 : f32 to vector<8x32xf32>
    %cst_6 = arith.constant 0.000000e+00 : f32
    %6 = vector.broadcast %cst_6 : f32 to vector<8x32xf32>
    %7 = vector.extract_strided_slice %4 {offsets = [0, 0], sizes = [8, 128], strides = [1, 1]} : vector<64x128xf32> to vector<8x128xf32>
    %cst_7 = arith.constant dense<0.000000e+00> : vector<8x128xf32>
    %8 = tpu.matmul %5, %1, %cst_7 {dimension_numbers = #tpu.dot_dimension_numbers<[1], [0], [0], [1], [0, 0, 1, 1], [], []>} : vector<8x32xf32>, vector<32x128xf32>, vector<8x128xf32> -> vector<8x128xf32>
    %9 = arith.addf %7, %8 : vector<8x128xf32>
    %10 = arith.negf %9 : vector<8x128xf32>
    %11 = math.exp %10 : vector<8x128xf32>
    %cst_8 = arith.constant 1.000000e+00 : f32
    %12 = vector.broadcast %cst_8 : f32 to vector<8x128xf32>
    %13 = arith.addf %12, %11 : vector<8x128xf32>
    %14 = arith.divf %12, %13 : vector<8x128xf32>
    %15 = vector.extract_strided_slice %14 {offsets = [0, 0], sizes = [8, 32], strides = [1, 1]} : vector<8x128xf32> to vector<8x32xf32>
    %16 = vector.extract_strided_slice %14 {offsets = [0, 32], sizes = [8, 32], strides = [1, 1]} : vector<8x128xf32> to vector<8x32xf32>
    %17 = vector.extract_strided_slice %14 {offsets = [0, 64], sizes = [8, 32], strides = [1, 1]} : vector<8x128xf32> to vector<8x32xf32>
    %cst_9 = arith.constant 2.000000e+00 : f32
    %18 = vector.broadcast %cst_9 : f32 to vector<8x32xf32>
    %19 = arith.mulf %18, %17 : vector<8x32xf32>
    %cst_10 = arith.constant 1.000000e+00 : f32
    %20 = vector.broadcast %cst_10 : f32 to vector<8x32xf32>
    %21 = arith.subf %19, %20 : vector<8x32xf32>
    %22 = vector.extract_strided_slice %14 {offsets = [0, 96], sizes = [8, 32], strides = [1, 1]} : vector<8x128xf32> to vector<8x32xf32>
    %23 = arith.mulf %16, %6 : vector<8x32xf32>
    %24 = arith.mulf %15, %21 : vector<8x32xf32>
    %25 = arith.addf %23, %24 : vector<8x32xf32>
    %26 = math.tanh %25 : vector<8x32xf32>
    %27 = arith.mulf %22, %26 : vector<8x32xf32>
    %28 = vector.extract_strided_slice %4 {offsets = [8, 0], sizes = [8, 128], strides = [1, 1]} : vector<64x128xf32> to vector<8x128xf32>
    %cst_11 = arith.constant dense<0.000000e+00> : vector<8x128xf32>
    %29 = tpu.matmul %27, %1, %cst_11 {dimension_numbers = #tpu.dot_dimension_numbers<[1], [0], [0], [1], [0, 0, 1, 1], [], []>} : vector<8x32xf32>, vector<32x128xf32>, vector<8x128xf32> -> vector<8x128xf32>
    %30 = arith.addf %28, %29 : vector<8x128xf32>
    %31 = arith.negf %30 : vector<8x128xf32>
    %32 = math.exp %31 : vector<8x128xf32>
    %cst_12 = arith.constant 1.000000e+00 : f32
    %33 = vector.broadcast %cst_12 : f32 to vector<8x128xf32>
    %34 = arith.addf %33, %32 : vector<8x128xf32>
    %35 = arith.divf %33, %34 : vector<8x128xf32>
    %36 = vector.extract_strided_slice %35 {offsets = [0, 0], sizes = [8, 32], strides = [1, 1]} : vector<8x128xf32> to vector<8x32xf32>
    %37 = vector.extract_strided_slice %35 {offsets = [0, 32], sizes = [8, 32], strides = [1, 1]} : vector<8x128xf32> to vector<8x32xf32>
    %38 = vector.extract_strided_slice %35 {offsets = [0, 64], sizes = [8, 32], strides = [1, 1]} : vector<8x128xf32> to vector<8x32xf32>
    %cst_13 = arith.constant 2.000000e+00 : f32
    %39 = vector.broadcast %cst_13 : f32 to vector<8x32xf32>
    %40 = arith.mulf %39, %38 : vector<8x32xf32>
    %cst_14 = arith.constant 1.000000e+00 : f32
    %41 = vector.broadcast %cst_14 : f32 to vector<8x32xf32>
    %42 = arith.subf %40, %41 : vector<8x32xf32>
    %43 = vector.extract_strided_slice %35 {offsets = [0, 96], sizes = [8, 32], strides = [1, 1]} : vector<8x128xf32> to vector<8x32xf32>
    %44 = arith.mulf %37, %25 : vector<8x32xf32>
    %45 = arith.mulf %36, %42 : vector<8x32xf32>
    %46 = arith.addf %44, %45 : vector<8x32xf32>
    %47 = math.tanh %46 : vector<8x32xf32>
    %48 = arith.mulf %43, %47 : vector<8x32xf32>
    %49 = vector.extract_strided_slice %4 {offsets = [16, 0], sizes = [8, 128], strides = [1, 1]} : vector<64x128xf32> to vector<8x128xf32>
    %cst_15 = arith.constant dense<0.000000e+00> : vector<8x128xf32>
    %50 = tpu.matmul %48, %1, %cst_15 {dimension_numbers = #tpu.dot_dimension_numbers<[1], [0], [0], [1], [0, 0, 1, 1], [], []>} : vector<8x32xf32>, vector<32x128xf32>, vector<8x128xf32> -> vector<8x128xf32>
    %51 = arith.addf %49, %50 : vector<8x128xf32>
    %52 = arith.negf %51 : vector<8x128xf32>
    %53 = math.exp %52 : vector<8x128xf32>
    %cst_16 = arith.constant 1.000000e+00 : f32
    %54 = vector.broadcast %cst_16 : f32 to vector<8x128xf32>
    %55 = arith.addf %54, %53 : vector<8x128xf32>
    %56 = arith.divf %54, %55 : vector<8x128xf32>
    %57 = vector.extract_strided_slice %56 {offsets = [0, 0], sizes = [8, 32], strides = [1, 1]} : vector<8x128xf32> to vector<8x32xf32>
    %58 = vector.extract_strided_slice %56 {offsets = [0, 32], sizes = [8, 32], strides = [1, 1]} : vector<8x128xf32> to vector<8x32xf32>
    %59 = vector.extract_strided_slice %56 {offsets = [0, 64], sizes = [8, 32], strides = [1, 1]} : vector<8x128xf32> to vector<8x32xf32>
    %cst_17 = arith.constant 2.000000e+00 : f32
    %60 = vector.broadcast %cst_17 : f32 to vector<8x32xf32>
    %61 = arith.mulf %60, %59 : vector<8x32xf32>
    %cst_18 = arith.constant 1.000000e+00 : f32
    %62 = vector.broadcast %cst_18 : f32 to vector<8x32xf32>
    %63 = arith.subf %61, %62 : vector<8x32xf32>
    %64 = vector.extract_strided_slice %56 {offsets = [0, 96], sizes = [8, 32], strides = [1, 1]} : vector<8x128xf32> to vector<8x32xf32>
    %65 = arith.mulf %58, %46 : vector<8x32xf32>
    %66 = arith.mulf %57, %63 : vector<8x32xf32>
    %67 = arith.addf %65, %66 : vector<8x32xf32>
    %68 = math.tanh %67 : vector<8x32xf32>
    %69 = arith.mulf %64, %68 : vector<8x32xf32>
    %70 = vector.extract_strided_slice %4 {offsets = [24, 0], sizes = [8, 128], strides = [1, 1]} : vector<64x128xf32> to vector<8x128xf32>
    %cst_19 = arith.constant dense<0.000000e+00> : vector<8x128xf32>
    %71 = tpu.matmul %69, %1, %cst_19 {dimension_numbers = #tpu.dot_dimension_numbers<[1], [0], [0], [1], [0, 0, 1, 1], [], []>} : vector<8x32xf32>, vector<32x128xf32>, vector<8x128xf32> -> vector<8x128xf32>
    %72 = arith.addf %70, %71 : vector<8x128xf32>
    %73 = arith.negf %72 : vector<8x128xf32>
    %74 = math.exp %73 : vector<8x128xf32>
    %cst_20 = arith.constant 1.000000e+00 : f32
    %75 = vector.broadcast %cst_20 : f32 to vector<8x128xf32>
    %76 = arith.addf %75, %74 : vector<8x128xf32>
    %77 = arith.divf %75, %76 : vector<8x128xf32>
    %78 = vector.extract_strided_slice %77 {offsets = [0, 0], sizes = [8, 32], strides = [1, 1]} : vector<8x128xf32> to vector<8x32xf32>
    %79 = vector.extract_strided_slice %77 {offsets = [0, 32], sizes = [8, 32], strides = [1, 1]} : vector<8x128xf32> to vector<8x32xf32>
    %80 = vector.extract_strided_slice %77 {offsets = [0, 64], sizes = [8, 32], strides = [1, 1]} : vector<8x128xf32> to vector<8x32xf32>
    %cst_21 = arith.constant 2.000000e+00 : f32
    %81 = vector.broadcast %cst_21 : f32 to vector<8x32xf32>
    %82 = arith.mulf %81, %80 : vector<8x32xf32>
    %cst_22 = arith.constant 1.000000e+00 : f32
    %83 = vector.broadcast %cst_22 : f32 to vector<8x32xf32>
    %84 = arith.subf %82, %83 : vector<8x32xf32>
    %85 = vector.extract_strided_slice %77 {offsets = [0, 96], sizes = [8, 32], strides = [1, 1]} : vector<8x128xf32> to vector<8x32xf32>
    %86 = arith.mulf %79, %67 : vector<8x32xf32>
    %87 = arith.mulf %78, %84 : vector<8x32xf32>
    %88 = arith.addf %86, %87 : vector<8x32xf32>
    %89 = math.tanh %88 : vector<8x32xf32>
    %90 = arith.mulf %85, %89 : vector<8x32xf32>
    %91 = vector.extract_strided_slice %4 {offsets = [32, 0], sizes = [8, 128], strides = [1, 1]} : vector<64x128xf32> to vector<8x128xf32>
    %cst_23 = arith.constant dense<0.000000e+00> : vector<8x128xf32>
    %92 = tpu.matmul %90, %1, %cst_23 {dimension_numbers = #tpu.dot_dimension_numbers<[1], [0], [0], [1], [0, 0, 1, 1], [], []>} : vector<8x32xf32>, vector<32x128xf32>, vector<8x128xf32> -> vector<8x128xf32>
    %93 = arith.addf %91, %92 : vector<8x128xf32>
    %94 = arith.negf %93 : vector<8x128xf32>
    %95 = math.exp %94 : vector<8x128xf32>
    %cst_24 = arith.constant 1.000000e+00 : f32
    %96 = vector.broadcast %cst_24 : f32 to vector<8x128xf32>
    %97 = arith.addf %96, %95 : vector<8x128xf32>
    %98 = arith.divf %96, %97 : vector<8x128xf32>
    %99 = vector.extract_strided_slice %98 {offsets = [0, 0], sizes = [8, 32], strides = [1, 1]} : vector<8x128xf32> to vector<8x32xf32>
    %100 = vector.extract_strided_slice %98 {offsets = [0, 32], sizes = [8, 32], strides = [1, 1]} : vector<8x128xf32> to vector<8x32xf32>
    %101 = vector.extract_strided_slice %98 {offsets = [0, 64], sizes = [8, 32], strides = [1, 1]} : vector<8x128xf32> to vector<8x32xf32>
    %cst_25 = arith.constant 2.000000e+00 : f32
    %102 = vector.broadcast %cst_25 : f32 to vector<8x32xf32>
    %103 = arith.mulf %102, %101 : vector<8x32xf32>
    %cst_26 = arith.constant 1.000000e+00 : f32
    %104 = vector.broadcast %cst_26 : f32 to vector<8x32xf32>
    %105 = arith.subf %103, %104 : vector<8x32xf32>
    %106 = vector.extract_strided_slice %98 {offsets = [0, 96], sizes = [8, 32], strides = [1, 1]} : vector<8x128xf32> to vector<8x32xf32>
    %107 = arith.mulf %100, %88 : vector<8x32xf32>
    %108 = arith.mulf %99, %105 : vector<8x32xf32>
    %109 = arith.addf %107, %108 : vector<8x32xf32>
    %110 = math.tanh %109 : vector<8x32xf32>
    %111 = arith.mulf %106, %110 : vector<8x32xf32>
    %112 = vector.extract_strided_slice %4 {offsets = [40, 0], sizes = [8, 128], strides = [1, 1]} : vector<64x128xf32> to vector<8x128xf32>
    %cst_27 = arith.constant dense<0.000000e+00> : vector<8x128xf32>
    %113 = tpu.matmul %111, %1, %cst_27 {dimension_numbers = #tpu.dot_dimension_numbers<[1], [0], [0], [1], [0, 0, 1, 1], [], []>} : vector<8x32xf32>, vector<32x128xf32>, vector<8x128xf32> -> vector<8x128xf32>
    %114 = arith.addf %112, %113 : vector<8x128xf32>
    %115 = arith.negf %114 : vector<8x128xf32>
    %116 = math.exp %115 : vector<8x128xf32>
    %cst_28 = arith.constant 1.000000e+00 : f32
    %117 = vector.broadcast %cst_28 : f32 to vector<8x128xf32>
    %118 = arith.addf %117, %116 : vector<8x128xf32>
    %119 = arith.divf %117, %118 : vector<8x128xf32>
    %120 = vector.extract_strided_slice %119 {offsets = [0, 0], sizes = [8, 32], strides = [1, 1]} : vector<8x128xf32> to vector<8x32xf32>
    %121 = vector.extract_strided_slice %119 {offsets = [0, 32], sizes = [8, 32], strides = [1, 1]} : vector<8x128xf32> to vector<8x32xf32>
    %122 = vector.extract_strided_slice %119 {offsets = [0, 64], sizes = [8, 32], strides = [1, 1]} : vector<8x128xf32> to vector<8x32xf32>
    %cst_29 = arith.constant 2.000000e+00 : f32
    %123 = vector.broadcast %cst_29 : f32 to vector<8x32xf32>
    %124 = arith.mulf %123, %122 : vector<8x32xf32>
    %cst_30 = arith.constant 1.000000e+00 : f32
    %125 = vector.broadcast %cst_30 : f32 to vector<8x32xf32>
    %126 = arith.subf %124, %125 : vector<8x32xf32>
    %127 = vector.extract_strided_slice %119 {offsets = [0, 96], sizes = [8, 32], strides = [1, 1]} : vector<8x128xf32> to vector<8x32xf32>
    %128 = arith.mulf %121, %109 : vector<8x32xf32>
    %129 = arith.mulf %120, %126 : vector<8x32xf32>
    %130 = arith.addf %128, %129 : vector<8x32xf32>
    %131 = math.tanh %130 : vector<8x32xf32>
    %132 = arith.mulf %127, %131 : vector<8x32xf32>
    %133 = vector.extract_strided_slice %4 {offsets = [48, 0], sizes = [8, 128], strides = [1, 1]} : vector<64x128xf32> to vector<8x128xf32>
    %cst_31 = arith.constant dense<0.000000e+00> : vector<8x128xf32>
    %134 = tpu.matmul %132, %1, %cst_31 {dimension_numbers = #tpu.dot_dimension_numbers<[1], [0], [0], [1], [0, 0, 1, 1], [], []>} : vector<8x32xf32>, vector<32x128xf32>, vector<8x128xf32> -> vector<8x128xf32>
    %135 = arith.addf %133, %134 : vector<8x128xf32>
    %136 = arith.negf %135 : vector<8x128xf32>
    %137 = math.exp %136 : vector<8x128xf32>
    %cst_32 = arith.constant 1.000000e+00 : f32
    %138 = vector.broadcast %cst_32 : f32 to vector<8x128xf32>
    %139 = arith.addf %138, %137 : vector<8x128xf32>
    %140 = arith.divf %138, %139 : vector<8x128xf32>
    %141 = vector.extract_strided_slice %140 {offsets = [0, 0], sizes = [8, 32], strides = [1, 1]} : vector<8x128xf32> to vector<8x32xf32>
    %142 = vector.extract_strided_slice %140 {offsets = [0, 32], sizes = [8, 32], strides = [1, 1]} : vector<8x128xf32> to vector<8x32xf32>
    %143 = vector.extract_strided_slice %140 {offsets = [0, 64], sizes = [8, 32], strides = [1, 1]} : vector<8x128xf32> to vector<8x32xf32>
    %cst_33 = arith.constant 2.000000e+00 : f32
    %144 = vector.broadcast %cst_33 : f32 to vector<8x32xf32>
    %145 = arith.mulf %144, %143 : vector<8x32xf32>
    %cst_34 = arith.constant 1.000000e+00 : f32
    %146 = vector.broadcast %cst_34 : f32 to vector<8x32xf32>
    %147 = arith.subf %145, %146 : vector<8x32xf32>
    %148 = vector.extract_strided_slice %140 {offsets = [0, 96], sizes = [8, 32], strides = [1, 1]} : vector<8x128xf32> to vector<8x32xf32>
    %149 = arith.mulf %142, %130 : vector<8x32xf32>
    %150 = arith.mulf %141, %147 : vector<8x32xf32>
    %151 = arith.addf %149, %150 : vector<8x32xf32>
    %152 = math.tanh %151 : vector<8x32xf32>
    %153 = arith.mulf %148, %152 : vector<8x32xf32>
    %154 = vector.extract_strided_slice %4 {offsets = [56, 0], sizes = [8, 128], strides = [1, 1]} : vector<64x128xf32> to vector<8x128xf32>
    %cst_35 = arith.constant dense<0.000000e+00> : vector<8x128xf32>
    %155 = tpu.matmul %153, %1, %cst_35 {dimension_numbers = #tpu.dot_dimension_numbers<[1], [0], [0], [1], [0, 0, 1, 1], [], []>} : vector<8x32xf32>, vector<32x128xf32>, vector<8x128xf32> -> vector<8x128xf32>
    %156 = arith.addf %154, %155 : vector<8x128xf32>
    %157 = arith.negf %156 : vector<8x128xf32>
    %158 = math.exp %157 : vector<8x128xf32>
    %cst_36 = arith.constant 1.000000e+00 : f32
    %159 = vector.broadcast %cst_36 : f32 to vector<8x128xf32>
    %160 = arith.addf %159, %158 : vector<8x128xf32>
    %161 = arith.divf %159, %160 : vector<8x128xf32>
    %162 = vector.extract_strided_slice %161 {offsets = [0, 0], sizes = [8, 32], strides = [1, 1]} : vector<8x128xf32> to vector<8x32xf32>
    %163 = vector.extract_strided_slice %161 {offsets = [0, 32], sizes = [8, 32], strides = [1, 1]} : vector<8x128xf32> to vector<8x32xf32>
    %164 = vector.extract_strided_slice %161 {offsets = [0, 64], sizes = [8, 32], strides = [1, 1]} : vector<8x128xf32> to vector<8x32xf32>
    %cst_37 = arith.constant 2.000000e+00 : f32
    %165 = vector.broadcast %cst_37 : f32 to vector<8x32xf32>
    %166 = arith.mulf %165, %164 : vector<8x32xf32>
    %cst_38 = arith.constant 1.000000e+00 : f32
    %167 = vector.broadcast %cst_38 : f32 to vector<8x32xf32>
    %168 = arith.subf %166, %167 : vector<8x32xf32>
    %169 = vector.extract_strided_slice %161 {offsets = [0, 96], sizes = [8, 32], strides = [1, 1]} : vector<8x128xf32> to vector<8x32xf32>
    %170 = arith.mulf %163, %151 : vector<8x32xf32>
    %171 = arith.mulf %162, %168 : vector<8x32xf32>
    %172 = arith.addf %170, %171 : vector<8x32xf32>
    %173 = math.tanh %172 : vector<8x32xf32>
    %174 = arith.mulf %169, %173 : vector<8x32xf32>
    %c0_39 = arith.constant 0 : index
    %c0_40 = arith.constant 0 : index
    %175 = vector.load %arg3[%c0_39, %c0_40] : memref<65x1xf32, #tpu.memory_space<vmem>>, vector<32x1xf32>
    %cst_41 = arith.constant dense<0.000000e+00> : vector<8x1xf32>
    %176 = tpu.matmul %174, %175, %cst_41 {dimension_numbers = #tpu.dot_dimension_numbers<[1], [0], [0], [1], [0, 0, 1, 1], [], []>} : vector<8x32xf32>, vector<32x1xf32>, vector<8x1xf32> -> vector<8x1xf32>
    %c32 = arith.constant 32 : index
    %c0_42 = arith.constant 0 : index
    %177 = vector.load %arg3[%c32, %c0_42] : memref<65x1xf32, #tpu.memory_space<vmem>>, vector<32x1xf32>
    %cst_43 = arith.constant dense<0.000000e+00> : vector<8x1xf32>
    %178 = tpu.matmul %27, %177, %cst_43 {dimension_numbers = #tpu.dot_dimension_numbers<[1], [0], [0], [1], [0, 0, 1, 1], [], []>} : vector<8x32xf32>, vector<32x1xf32>, vector<8x1xf32> -> vector<8x1xf32>
    %179 = arith.addf %176, %178 : vector<8x1xf32>
    %c64 = arith.constant 64 : index
    %c0_44 = arith.constant 0 : index
    %180 = vector.load %arg3[%c64, %c0_44] : memref<65x1xf32, #tpu.memory_space<vmem>>, vector<1x1xf32>
    %181 = vector.broadcast %180 : vector<1x1xf32> to vector<8x1xf32>
    %182 = arith.addf %179, %181 : vector<8x1xf32>
    %c0_45 = arith.constant 0 : index
    %c0_46 = arith.constant 0 : index
    %c0_47 = arith.constant 0 : index
    %183 = vector.load %arg4[%c0_45, %c0_46, %c0_47] : memref<1x8x1xf32, #tpu.memory_space<vmem>>, vector<1x8x1xf32>
    %184 = vector.shape_cast %183 : vector<1x8x1xf32> to vector<8x1xf32>
    %185 = vector.shape_cast %182 : vector<8x1xf32> to vector<1x8x1xf32>
    tpu.vector_store %arg4[%c0_45, %c0_46, %c0_47], %185 {strides = array<i32>} : memref<1x8x1xf32, #tpu.memory_space<vmem>>, vector<1x8x1xf32>,
    return
  }
  func.func @transform_0(%arg0: i32) -> (i32, i32, i32) {
    %c0_i32 = arith.constant 0 : i32
    %c0_i32_0 = arith.constant 0 : i32
    %c0_i32_1 = arith.constant 0 : i32
    return %arg0, %c0_i32, %c0_i32_0 : i32, i32, i32
  }
  func.func @transform_1(%arg0: i32) -> (i32, i32) {
    %c0_i32 = arith.constant 0 : i32
    %c0_i32_0 = arith.constant 0 : i32
    %c0_i32_1 = arith.constant 0 : i32
    return %c0_i32, %c0_i32_0 : i32, i32
  }
  func.func @transform_2(%arg0: i32) -> (i32, i32) {
    %c0_i32 = arith.constant 0 : i32
    %c0_i32_0 = arith.constant 0 : i32
    %c0_i32_1 = arith.constant 0 : i32
    return %c0_i32, %c0_i32_0 : i32, i32
  }
  func.func @transform_3(%arg0: i32) -> (i32, i32, i32) {
    %c0_i32 = arith.constant 0 : i32
    %c0_i32_0 = arith.constant 0 : i32
    %c0_i32_1 = arith.constant 0 : i32
    return %arg0, %c0_i32, %c0_i32_0 : i32, i32, i32
  }
}

</mosaic_0001>

<bundles_post_ra>
// kernel: lstm_sentiment_forward.1
= control target key start
LH: loop header
LB: loop body
LE: loop exit
PB: predicated region body
PF: predicated region fallthrough
CT: control target
= control target key end

     0   :  { %v1406_v0 = vmov 0.0   ;;  %vm1407_vm0 = vmmov 0   ;;  %vm29_vm1 = vcmask 195584   ;;  %s1409_s30 = smov 32   ;;  %vm159_vm2 = vcmask 261120   ;;  %s1674_s1 = inlined_call_operand.vmem [shape: f32[56,128], index: 1, kind: input, shape index: {}]   ;;  %s1675_s0 = inlined_call_operand.vmem [shape: f32[1,64,24], index: 0, kind: input, shape index: {}]   ;;  %s1676_s2 = inlined_call_operand.vmem [shape: f32[65,1], index: 2, kind: input, shape index: {}]   ;;  %s1677_s3 = inlined_call_operand.vmem [shape: f32[1,8,1], index: 3, kind: output, shape index: {}]  }
   0x1   :  { %1244 = vmatprep.subr.mxu1 %v1406_v0  ;;  %v16_v1 = vld [vmem:[%s1674_s1 + $0x10] sm:$0xff]  ;;  %v15_v3 = vld [vmem:[%s1674_s1 + $0x8] sm:$0xff]  ;;  %1252 = vmatprep.mubr.msk.f32.mxu1 %vm1407_vm0, %v1406_v0  ;;  %v14_v5 = vld [vmem:[%s1674_s1] sm:$0xff]  ;;  %vm1125_vm3 = vcmask 7168  }
   0x2   :  { %v1437_v2 = vld [vmem:[%s1674_s1 + $0x30] sm:$0xff]  ;;  %1226 = vmatprep.subr.mxu0 %v16_v1  ;;  %v1448_v4 = vld [vmem:[%s1674_s1 + $0x28] sm:$0xff]  ;;  %v1457_v6 = vld [vmem:[%s1674_s1 + $0x20] sm:$0xff] }
   0x3   :  { %1245 = vmatpush3.msra.mxu1 %v1437_v2  ;;  %1227 = vmatpush3.msra.mxu0 %v16_v1  ;;  %v21_v7 = vld [vmem:[%s1675_s0] sm:$0xff]  ;;  %v22_v8 = vld [vmem:[%s1675_s0 + $0x8] sm:$0xff]  ;;  %v1471_v9 = vld [vmem:[%s1674_s1 + $0x18] sm:$0xff]  ;;  %s1408_s1 = smov 64  }
   0x4   :  { %1246 = vmatprep.subr.mxu1 %v1406_v0  ;;  %1228 = vmatprep.subr.mxu0 %v15_v3  ;;  %v23_v44 = vld [vmem:[%s1675_s0 + $0x10] sm:$0xff]  ;;  %v24_v45 = vld [vmem:[%s1675_s0 + $0x18] sm:$0xff]  ;;  %v25_v46 = vld [vmem:[%s1675_s0 + $0x20] sm:$0xff] }
   0x5   :  { %1247 = vmatpush3.msra.mxu1 %v1448_v4  ;;  %1229 = vmatpush3.msra.mxu0 %v15_v3  ;;  %v26_v47 = vld [vmem:[%s1675_s0 + $0x28] sm:$0xff]  ;;  %v27_v48 = vld [vmem:[%s1675_s0 + $0x30] sm:$0xff]  ;;  %v28_v49 = vld [vmem:[%s1675_s0 + $0x38] sm:$0xff] }
   0x6   :  { %1248 = vmatprep.subr.mxu1 %v1406_v0  ;;  %1230 = vmatprep.subr.mxu0 %v14_v5 }
   0x7   :  { %1249 = vmatpush3.msra.mxu1 %v1457_v6  ;;  %1231 = vmatpush3.msra.mxu0 %v14_v5 }
   0x8   :  { %1232 = vmatprep.mubr.msk.f32.mxu0 %vm29_vm1, %v21_v7  ;;  %1250 = vmatprep.subr.mxu1 %v1406_v0 }
   0x9   :  { %1233 = vmatmul.mubr.msk.f32.vlgmr.msra.gmra.mxu0 %vm29_vm1, %v22_v8  ;;  %1251 = vmatpush3.msra.mxu1 %v1471_v9 }
   0xa   :  { %1266 = vmatprep.subr.mxu0 %v1406_v0  ;;  %1253 = vmatmul.mubr.f32.vlgmr.msra.gmra.mxu1 %v1406_v0 }
   0xb   :  { %1255 = vmatprep.subr.mxu1 %v1406_v0  ;;  %1263 = vmatprep.mubr.msk.f32.mxu1 %vm1407_vm0, %v1406_v0 }
   0xc   :  { %1256 = vmatpush3.msra.mxu1 %v1437_v2  ;;  %1267 = vmatpush3.msra.mxu0 %v1437_v2 }
   0xd   :  { %1257 = vmatprep.subr.mxu1 %v1406_v0  ;;  %1268 = vmatprep.subr.mxu0 %v1406_v0 }
   0xe   :  { %1258 = vmatpush3.msra.mxu1 %v1448_v4  ;;  %1269 = vmatpush3.msra.mxu0 %v1448_v4 }
   0xf   :  { %1259 = vmatprep.subr.mxu1 %v1406_v0  ;;  %1270 = vmatprep.subr.mxu0 %v1406_v0 }
  0x10   :  { %1260 = vmatpush3.msra.mxu1 %v1457_v6  ;;  %1271 = vmatpush3.msra.mxu0 %v1457_v6 }
  0x11   :  { %1261 = vmatprep.subr.mxu1 %v1406_v0  ;;  %1272 = vmatprep.subr.mxu0 %v1406_v0 }
  0x12   :  { %1262 = vmatpush3.msra.mxu1 %v1471_v9  ;;  %1273 = vmatpush3.msra.mxu0 %v1471_v9 }
  0x13   :  { %1277 = vmatprep.subr.mxu1 %v1406_v0  ;;  %1288 = vmatprep.subr.mxu0 %v1406_v0 }
  0x14   :  { %1235 = vmatprep.mubr.msk.f32.mxu0 %vm29_vm1, %v23_v44 }
  0x15   :  { %1236 = vmatmul.mubr.msk.f32.gmra.mxu0 %vm29_vm1, %v24_v45 }
  0x16   :  { %1238 = vmatprep.mubr.msk.f32.mxu0 %vm29_vm1, %v25_v46 }
  0x19   :  { %1239 = vmatmul.mubr.msk.f32.gmra.mxu0 %vm29_vm1, %v26_v47 }
  0x1a   :  { %1241 = vmatprep.mubr.msk.f32.mxu0 %vm29_vm1, %v27_v48 }
  0x1d   :  { %1242 = vmatmul.mubr.msk.f32.gmra.mxu0 %vm29_vm1, %v28_v49 }
  0x1e   :  { %1274 = vmatprep.mubr.msk.f32.mxu0 %vm1407_vm0, %v1406_v0 }
  0xc9   :  { %v1234_v10 = vpop.f32.mrf.mxu0 }
  0xca   :  { %v229_v11 = vpop.f32.mrf.mxu1 }
  0xcb   :  { %v120_v12 = vpop.f32.mrf.mxu0 }
  0xcc   :  { %v233_v13 = vadd.f32 %v229_v11, %v120_v12  ;;  %v1254_v14 = vpop.f32.mrf.mxu1 }
  0xce   :  { %v1139_v15 = vmul.f32 -1.442695, %v233_v13 }
  0xd0   :  { %1358 = vpow2.f32 %v1139_v15 }
  0xd5   :  { %v1237_v54 = vpop.f32.mrf.mxu0 }
  0xd7   :  { %v130_v55 = vpop.f32.mrf.mxu0 }
  0xd9   :  { %v1557_v56 = vpop.f32.mrf.mxu0 }
  0xdb   :  { %v1559_v57 = vpop.f32.mrf.mxu0 }
  0xdd   :  { %v1359_v16 = vpop.eup %1358  ;;  %v1561_v58 = vpop.f32.mrf.mxu0 }
  0xde   :  { %v237_v17 = vadd.f32 1.0, %v1359_v16 }
  0xdf   :  { %v1563_v59 = vpop.f32.mrf.mxu0 }
  0xe0   :  { %1360 = vrcp.f32 %v237_v17 }
  0xed   :  { %v1361_v18 = vpop.eup %1360 }
  0xee   :  { %v240_v19 = vmul.f32 2.0, %v1361_v18  ;;  %v242_v23 = vmul.f32 0.0, %v1361_v18 }
  0xf0   :  { %v1140_v20 = vadd.f32 -1.0, %v240_v19 }
  0xf2   :  { %244 = vrot.lane.b32.xlu0 %v1140_v20, %s1408_s1 }
 0x164   :  { %v245_v21 = vpop.permute.xlu0 %244 }
 0x165   :  { %v247_v22 = vmul.f32 %v1361_v18, %v245_v21 }
 0x167   :  { %249 = vrot.lane.b32.xlu0 %v247_v22, %s1409_s30 }
 0x1d9   :  { %v250_v24 = vpop.permute.xlu0 %249 }
 0x1da   :  { %v252_v25 = vadd.f32 %v250_v24, %v242_v23 }
 0x1dc   :  { %1362 = vtanh.f32 %v252_v25 }
 0x1e9   :  { %v1363_v26 = vpop.eup %1362 }
 0x1ea   :  { %255 = vrot.lane.b32.xlu1 %v1363_v26, %s1408_s1 }
 0x25c   :  { %v256_v27 = vpop.permute.xlu1 %255 }
 0x25d   :  { %v258_v28 = vmul.f32 %v1361_v18, %v256_v27 }
 0x25f   :  { %260 = vrot.lane.b32.xlu1 %v258_v28, %s1409_s30 }
 0x2d1   :  { %v1502_v29 = vpop.permute.xlu1 %260 }
 0x2d2   :  { %1264 = vmatmul.mubr.msk.f32.vlgmr.msra.gmra.mxu1 %vm159_vm2, %v1502_v29 }
 0x2d3   :  { %1278 = vmatpush3.msra.mxu1 %v1437_v2  ;;  %1285 = vmatprep.mubr.msk.f32.mxu1 %vm1407_vm0, %v1406_v0 }
 0x2d4   :  { %1279 = vmatprep.subr.mxu1 %v1406_v0 }
 0x2d5   :  { %1280 = vmatpush3.msra.mxu1 %v1448_v4 }
 0x2d6   :  { %1281 = vmatprep.subr.mxu1 %v1406_v0 }
 0x2d7   :  { %1282 = vmatpush3.msra.mxu1 %v1457_v6 }
 0x2d8   :  { %1283 = vmatprep.subr.mxu1 %v1406_v0 }
 0x2d9   :  { %1284 = vmatpush3.msra.mxu1 %v1471_v9 }
 0x2da   :  { %1299 = vmatprep.subr.mxu1 %v1406_v0 }
 0x392   :  { %v330_v30 = vpop.f32.mrf.mxu1 }
 0x393   :  { %v334_v31 = vadd.f32 %v1234_v10, %v330_v30 }
 0x394   :  { %v1265_v32 = vpop.f32.mrf.mxu1 }
 0x395   :  { %v1142_v33 = vmul.f32 -1.442695, %v334_v31 }
 0x397   :  { %1364 = vpow2.f32 %v1142_v33 }
 0x3a4   :  { %v1365_v34 = vpop.eup %1364 }
 0x3a5   :  { %v338_v35 = vadd.f32 1.0, %v1365_v34 }
 0x3a7   :  { %1366 = vrcp.f32 %v338_v35 }
 0x3b4   :  { %v1367_v36 = vpop.eup %1366 }
 0x3b5   :  { %v341_v37 = vmul.f32 2.0, %v1367_v36  ;;  %v343_v41 = vmul.f32 %v1367_v36, %v252_v25 }
 0x3b7   :  { %v1143_v38 = vadd.f32 -1.0, %v341_v37 }
 0x3b9   :  { %345 = vrot.lane.b32.xlu0 %v1143_v38, %s1408_s1 }
 0x42b   :  { %v346_v39 = vpop.permute.xlu0 %345 }
 0x42c   :  { %v348_v40 = vmul.f32 %v1367_v36, %v346_v39 }
 0x42e   :  { %350 = vrot.lane.b32.xlu1 %v348_v40, %s1409_s30 }
 0x4a0   :  { %v351_v42 = vpop.permute.xlu1 %350 }
 0x4a1   :  { %v353_v43 = vadd.f32 %v351_v42, %v343_v41 }
 0x4a3   :  { %1368 = vtanh.f32 %v353_v43 }
 0x4b0   :  { %v1369_v50 = vpop.eup %1368 }
 0x4b1   :  { %356 = vrot.lane.b32.xlu0 %v1369_v50, %s1408_s1 }
 0x523   :  { %v357_v51 = vpop.permute.xlu0 %356 }
 0x524   :  { %v359_v52 = vmul.f32 %v1367_v36, %v357_v51 }
 0x526   :  { %361 = vrot.lane.b32.xlu1 %v359_v52, %s1409_s30 }
 0x598   :  { %v362_v53 = vpop.permute.xlu1 %361 }
 0x599   :  { %1275 = vmatmul.mubr.msk.f32.vlgmr.msra.gmra.mxu0 %vm159_vm2, %v362_v53 }
 0x59a   :  { %1289 = vmatpush3.msra.mxu0 %v1437_v2  ;;  %1296 = vmatprep.mubr.msk.f32.mxu0 %vm1407_vm0, %v1406_v0 }
 0x59b   :  { %1290 = vmatprep.subr.mxu0 %v1406_v0 }
 0x59c   :  { %1291 = vmatpush3.msra.mxu0 %v1448_v4 }
 0x59d   :  { %1292 = vmatprep.subr.mxu0 %v1406_v0 }
 0x59e   :  { %1293 = vmatpush3.msra.mxu0 %v1457_v6 }
 0x59f   :  { %1294 = vmatprep.subr.mxu0 %v1406_v0 }
 0x5a0   :  { %1295 = vmatpush3.msra.mxu0 %v1471_v9 }
 0x5a1   :  { %1310 = vmatprep.subr.mxu0 %v1406_v0 }
 0x659   :  { %v431_v60 = vpop.f32.mrf.mxu0 }
 0x65a   :  { %v435_v61 = vadd.f32 %v431_v60, %v130_v55 }
 0x65b   :  { %v1276_v62 = vpop.f32.mrf.mxu0 }
 0x65c   :  { %v1145_v63 = vmul.f32 -1.442695, %v435_v61 }
 0x65e   :  { %1370 = vpow2.f32 %v1145_v63 }
 0x66b   :  { %v1371_v1 = vpop.eup %1370 }
 0x66c   :  { %v439_v3 = vadd.f32 1.0, %v1371_v1 }
 0x66e   :  { %1372 = vrcp.f32 %v439_v3 }
 0x67b   :  { %v1373_v5 = vpop.eup %1372 }
 0x67c   :  { %v442_v7 = vmul.f32 2.0, %v1373_v5  ;;  %v444_v12 = vmul.f32 %v1373_v5, %v353_v43 }
 0x67e   :  { %v1146_v8 = vadd.f32 -1.0, %v442_v7 }
 0x680   :  { %446 = vrot.lane.b32.xlu0 %v1146_v8, %s1408_s1 }
 0x6f2   :  { %v447_v10 = vpop.permute.xlu0 %446 }
 0x6f3   :  { %v449_v11 = vmul.f32 %v1373_v5, %v447_v10 }
 0x6f5   :  { %451 = vrot.lane.b32.xlu1 %v449_v11, %s1409_s30 }
 0x767   :  { %v452_v13 = vpop.permute.xlu1 %451 }
 0x768   :  { %v454_v14 = vadd.f32 %v452_v13, %v444_v12  ;;  %v973_v12 = vld [vmem:[%s1676_s2 + $0x38] sm:$0xff] }
 0x76a   :  { %1374 = vtanh.f32 %v454_v14 }
 0x777   :  { %v1375_v15 = vpop.eup %1374 }
 0x778   :  { %457 = vrot.lane.b32.xlu0 %v1375_v15, %s1408_s1  ;;  %v971_v15 = vld [vmem:[%s1676_s2 + $0x28] sm:$0xff] }
 0x7ea   :  { %v458_v16 = vpop.permute.xlu0 %457 }
 0x7eb   :  { %v460_v17 = vmul.f32 %v1373_v5, %v458_v16  ;;  %v970_v16 = vld [vmem:[%s1676_s2 + $0x20] sm:$0xff] }
 0x7ed   :  { %462 = vrot.lane.b32.xlu1 %v460_v17, %s1409_s30 }
 0x85f   :  { %v463_v18 = vpop.permute.xlu1 %462 }
 0x860   :  { %1286 = vmatmul.mubr.msk.f32.vlgmr.msra.gmra.mxu1 %vm159_vm2, %v463_v18 }
 0x861   :  { %1300 = vmatpush3.msra.mxu1 %v1437_v2  ;;  %1307 = vmatprep.mubr.msk.f32.mxu1 %vm1407_vm0, %v1406_v0 }
 0x862   :  { %1301 = vmatprep.subr.mxu1 %v1406_v0 }
 0x863   :  { %1302 = vmatpush3.msra.mxu1 %v1448_v4 }
 0x864   :  { %1303 = vmatprep.subr.mxu1 %v1406_v0 }
 0x865   :  { %1304 = vmatpush3.msra.mxu1 %v1457_v6 }
 0x866   :  { %1305 = vmatprep.subr.mxu1 %v1406_v0 }
 0x867   :  { %1306 = vmatpush3.msra.mxu1 %v1471_v9 }
 0x868   :  { %1321 = vmatprep.subr.mxu1 %v1406_v0 }
 0x920   :  { %v532_v19 = vpop.f32.mrf.mxu1 }
 0x921   :  { %v536_v20 = vadd.f32 %v1237_v54, %v532_v19 }
 0x922   :  { %v1287_v21 = vpop.f32.mrf.mxu1 }
 0x923   :  { %v1148_v22 = vmul.f32 -1.442695, %v536_v20 }
 0x925   :  { %1376 = vpow2.f32 %v1148_v22 }
 0x932   :  { %v1377_v23 = vpop.eup %1376 }
 0x933   :  { %v540_v24 = vadd.f32 1.0, %v1377_v23 }
 0x935   :  { %1378 = vrcp.f32 %v540_v24 }
 0x942   :  { %v1379_v25 = vpop.eup %1378 }
 0x943   :  { %v543_v26 = vmul.f32 2.0, %v1379_v25  ;;  %v545_v31 = vmul.f32 %v1379_v25, %v454_v14  ;;  %v972_v14 = vld [vmem:[%s1676_s2 + $0x30] sm:$0xff] }
 0x945   :  { %v1149_v27 = vadd.f32 -1.0, %v543_v26 }
 0x947   :  { %547 = vrot.lane.b32.xlu0 %v1149_v27, %s1408_s1 }
 0x9b9   :  { %v548_v28 = vpop.permute.xlu0 %547 }
 0x9ba   :  { %v550_v30 = vmul.f32 %v1379_v25, %v548_v28 }
 0x9bc   :  { %552 = vrot.lane.b32.xlu1 %v550_v30, %s1409_s30 }
 0xa2e   :  { %v553_v32 = vpop.permute.xlu1 %552 }
 0xa2f   :  { %v555_v33 = vadd.f32 %v553_v32, %v545_v31 }
 0xa31   :  { %1380 = vtanh.f32 %v555_v33 }
 0xa3e   :  { %v1381_v34 = vpop.eup %1380 }
 0xa3f   :  { %558 = vrot.lane.b32.xlu0 %v1381_v34, %s1408_s1 }
 0xab1   :  { %v559_v35 = vpop.permute.xlu0 %558 }
 0xab2   :  { %v561_v36 = vmul.f32 %v1379_v25, %v559_v35 }
 0xab4   :  { %563 = vrot.lane.b32.xlu1 %v561_v36, %s1409_s30 }
 0xb26   :  { %v564_v37 = vpop.permute.xlu1 %563 }
 0xb27   :  { %1297 = vmatmul.mubr.msk.f32.vlgmr.msra.gmra.mxu0 %vm159_vm2, %v564_v37 }
 0xb28   :  { %1311 = vmatpush3.msra.mxu0 %v1437_v2  ;;  %1318 = vmatprep.mubr.msk.f32.mxu0 %vm1407_vm0, %v1406_v0 }
 0xb29   :  { %1312 = vmatprep.subr.mxu0 %v1406_v0 }
 0xb2a   :  { %1313 = vmatpush3.msra.mxu0 %v1448_v4 }
 0xb2b   :  { %1314 = vmatprep.subr.mxu0 %v1406_v0 }
 0xb2c   :  { %1315 = vmatpush3.msra.mxu0 %v1457_v6 }
 0xb2d   :  { %1316 = vmatprep.subr.mxu0 %v1406_v0 }
 0xb2e   :  { %1317 = vmatpush3.msra.mxu0 %v1471_v9 }
 0xb2f   :  { %1332 = vmatprep.subr.mxu0 %v1406_v0 }
 0xbe7   :  { %v633_v38 = vpop.f32.mrf.mxu0 }
 0xbe8   :  { %v637_v39 = vadd.f32 %v633_v38, %v1559_v57 }
 0xbe9   :  { %v1298_v40 = vpop.f32.mrf.mxu0 }
 0xbea   :  { %v1151_v41 = vmul.f32 -1.442695, %v637_v39 }
 0xbec   :  { %1382 = vpow2.f32 %v1151_v41 }
 0xbf9   :  { %v1383_v42 = vpop.eup %1382 }
 0xbfa   :  { %v641_v43 = vadd.f32 1.0, %v1383_v42 }
 0xbfc   :  { %1384 = vrcp.f32 %v641_v43 }
 0xc09   :  { %v1385_v44 = vpop.eup %1384 }
 0xc0a   :  { %v644_v45 = vmul.f32 2.0, %v1385_v44  ;;  %v646_v49 = vmul.f32 %v1385_v44, %v555_v33 }
 0xc0c   :  { %v1152_v46 = vadd.f32 -1.0, %v644_v45 }
 0xc0e   :  { %648 = vrot.lane.b32.xlu0 %v1152_v46, %s1408_s1 }
 0xc80   :  { %v649_v47 = vpop.permute.xlu0 %648 }
 0xc81   :  { %v651_v48 = vmul.f32 %v1385_v44, %v649_v47 }
 0xc83   :  { %653 = vrot.lane.b32.xlu1 %v651_v48, %s1409_s30 }
 0xcf5   :  { %v654_v50 = vpop.permute.xlu1 %653 }
 0xcf6   :  { %v656_v51 = vadd.f32 %v654_v50, %v646_v49  ;;  %v968_v50 = vld [vmem:[%s1676_s2 + $0x10] sm:$0xff] }
 0xcf8   :  { %1386 = vtanh.f32 %v656_v51 }
 0xd05   :  { %v1387_v52 = vpop.eup %1386 }
 0xd06   :  { %659 = vrot.lane.b32.xlu0 %v1387_v52, %s1408_s1  ;;  %v966_v52 = vld [vmem:[%s1676_s2] sm:$0xff] }
 0xd78   :  { %v660_v53 = vpop.permute.xlu0 %659 }
 0xd79   :  { %v662_v54 = vmul.f32 %v1385_v44, %v660_v53 }
 0xd7b   :  { %664 = vrot.lane.b32.xlu1 %v662_v54, %s1409_s30 }
 0xded   :  { %v665_v55 = vpop.permute.xlu1 %664 }
 0xdee   :  { %1308 = vmatmul.mubr.msk.f32.vlgmr.msra.gmra.mxu1 %vm159_vm2, %v665_v55 }
 0xdef   :  { %1322 = vmatpush3.msra.mxu1 %v1437_v2  ;;  %1329 = vmatprep.mubr.msk.f32.mxu1 %vm1407_vm0, %v1406_v0 }
 0xdf0   :  { %1323 = vmatprep.subr.mxu1 %v1406_v0 }
 0xdf1   :  { %1324 = vmatpush3.msra.mxu1 %v1448_v4 }
 0xdf2   :  { %1325 = vmatprep.subr.mxu1 %v1406_v0 }
 0xdf3   :  { %1326 = vmatpush3.msra.mxu1 %v1457_v6 }
 0xdf4   :  { %1327 = vmatprep.subr.mxu1 %v1406_v0 }
 0xdf5   :  { %1328 = vmatpush3.msra.mxu1 %v1471_v9 }
 0xdf6   :  { %1343 = vmatprep.subr.mxu1 %v1406_v0 }
 0xeae   :  { %v734_v57 = vpop.f32.mrf.mxu1 }
 0xeaf   :  { %v738_v2 = vadd.f32 %v1557_v56, %v734_v57 }
 0xeb0   :  { %v1309_v60 = vpop.f32.mrf.mxu1 }
 0xeb1   :  { %v1154_v61 = vmul.f32 -1.442695, %v738_v2  ;;  %v1164_v60 = vld [vmem:[%s1676_s2 + $0x40] ss:$0 sm:$0xff] }
 0xeb3   :  { %1388 = vpow2.f32 %v1154_v61 }
 0xec0   :  { %v1389_v62 = vpop.eup %1388 }
 0xec1   :  { %v742_v63 = vadd.f32 1.0, %v1389_v62 }
 0xec3   :  { %1390 = vrcp.f32 %v742_v63 }
 0xed0   :  { %v1391_v4 = vpop.eup %1390 }
 0xed1   :  { %v745_v1 = vmul.f32 2.0, %v1391_v4  ;;  %v747_v9 = vmul.f32 %v1391_v4, %v656_v51  ;;  %v967_v51 = vld [vmem:[%s1676_s2 + $0x8] sm:$0xff] }
 0xed3   :  { %v1155_v3 = vadd.f32 -1.0, %v745_v1 }
 0xed5   :  { %749 = vrot.lane.b32.xlu0 %v1155_v3, %s1408_s1 }
 0xf47   :  { %v750_v6 = vpop.permute.xlu0 %749 }
 0xf48   :  { %v752_v5 = vmul.f32 %v1391_v4, %v750_v6 }
 0xf4a   :  { %754 = vrot.lane.b32.xlu1 %v752_v5, %s1409_s30 }
 0xfbc   :  { %v755_v7 = vpop.permute.xlu1 %754 }
 0xfbd   :  { %v757_v8 = vadd.f32 %v755_v7, %v747_v9 }
 0xfbf   :  { %1392 = vtanh.f32 %v757_v8 }
 0xfcc   :  { %v1393_v56 = vpop.eup %1392 }
 0xfcd   :  { %760 = vrot.lane.b32.xlu0 %v1393_v56, %s1408_s1 }
0x103f   :  { %v761_v10 = vpop.permute.xlu0 %760 }
0x1040   :  { %v763_v11 = vmul.f32 %v1391_v4, %v761_v10 }
0x1042   :  { %765 = vrot.lane.b32.xlu1 %v763_v11, %s1409_s30 }
0x10b4   :  { %v766_v13 = vpop.permute.xlu1 %765 }
0x10b5   :  { %1319 = vmatmul.mubr.msk.f32.vlgmr.msra.gmra.mxu0 %vm159_vm2, %v766_v13 }
0x10b6   :  { %1333 = vmatpush3.msra.mxu0 %v973_v12  ;;  %1340 = vmatprep.mubr.msk.f32.mxu0 %vm1407_vm0, %v1406_v0 }
0x10b7   :  { %1334 = vmatprep.subr.mxu0 %v1406_v0 }
0x10b8   :  { %1335 = vmatpush3.msra.mxu0 %v972_v14 }
0x10b9   :  { %1336 = vmatprep.subr.mxu0 %v1406_v0 }
0x10ba   :  { %1337 = vmatpush3.msra.mxu0 %v971_v15 }
0x10bb   :  { %1338 = vmatprep.subr.mxu0 %v1406_v0 }
0x10bc   :  { %1339 = vmatpush3.msra.mxu0 %v970_v16 }
0x10bd   :  { %1341 = vmatmul.mubr.msk.f32.vlgmr.msra.gmra.mxu0 %vm159_vm2, %v1502_v29 }
0x1175   :  { %v835_v17 = vpop.f32.mrf.mxu0 }
0x1176   :  { %v839_v18 = vadd.f32 %v835_v17, %v1563_v59 }
0x1177   :  { %v1320_v19 = vpop.f32.mrf.mxu0 }
0x1178   :  { %v1157_v20 = vmul.f32 -1.442695, %v839_v18 }
0x117a   :  { %1394 = vpow2.f32 %v1157_v20 }
0x117d   :  { %v1637_v21 = vpop.f32.mrf.mxu0 }
0x117f   :  { %v1342_v22 = vpop.f32.mrf.mxu0 }
0x1187   :  { %v1395_v23 = vpop.eup %1394 }
0x1188   :  { %v843_v24 = vadd.f32 1.0, %v1395_v23 }
0x118a   :  { %1396 = vrcp.f32 %v843_v24 }
0x1197   :  { %v1397_v25 = vpop.eup %1396 }
0x1198   :  { %v846_v26 = vmul.f32 2.0, %v1397_v25  ;;  %v848_v29 = vmul.f32 %v1397_v25, %v757_v8 }
0x119a   :  { %v1158_v27 = vadd.f32 -1.0, %v846_v26 }
0x119c   :  { %850 = vrot.lane.b32.xlu0 %v1158_v27, %s1408_s1 }
0x120e   :  { %v851_v28 = vpop.permute.xlu0 %850 }
0x120f   :  { %v853_v30 = vmul.f32 %v1397_v25, %v851_v28 }
0x1211   :  { %855 = vrot.lane.b32.xlu1 %v853_v30, %s1409_s30 }
0x1283   :  { %v856_v59 = vpop.permute.xlu1 %855 }
0x1284   :  { %v858_v31 = vadd.f32 %v856_v59, %v848_v29 }
0x1286   :  { %1398 = vtanh.f32 %v858_v31 }
0x1293   :  { %v1399_v32 = vpop.eup %1398 }
0x1294   :  { %861 = vrot.lane.b32.xlu0 %v1399_v32, %s1408_s1 }
0x1306   :  { %v862_v33 = vpop.permute.xlu0 %861 }
0x1307   :  { %v864_v34 = vmul.f32 %v1397_v25, %v862_v33 }
0x1309   :  { %866 = vrot.lane.b32.xlu1 %v864_v34, %s1409_s30 }
0x137b   :  { %v867_v35 = vpop.permute.xlu1 %866 }
0x137c   :  { %1330 = vmatmul.mubr.msk.f32.vlgmr.msra.gmra.mxu1 %vm159_vm2, %v867_v35 }
0x137d   :  { %1351 = vmatprep.mubr.msk.f32.mxu1 %vm1407_vm0, %v1406_v0 }
0x143c   :  { %v936_v36 = vpop.f32.mrf.mxu1 }
0x143d   :  { %v940_v37 = vadd.f32 %v1561_v58, %v936_v36  ;;  %v969_v58 = vld [vmem:[%s1676_s2 + $0x18] sm:$0xff] }
0x143e   :  { %v1331_v38 = vpop.f32.mrf.mxu1  ;;  %1344 = vmatpush3.msra.mxu1 %v969_v58 }
0x143f   :  { %v1160_v39 = vmul.f32 -1.442695, %v940_v37  ;;  %1345 = vmatprep.subr.mxu1 %v1406_v0 }
0x1440   :  { %1346 = vmatpush3.msra.mxu1 %v968_v50 }
0x1441   :  { %1400 = vpow2.f32 %v1160_v39  ;;  %1347 = vmatprep.subr.mxu1 %v1406_v0 }
0x1442   :  { %1348 = vmatpush3.msra.mxu1 %v967_v51 }
0x1443   :  { %1349 = vmatprep.subr.mxu1 %v1406_v0 }
0x1444   :  { %1350 = vmatpush3.msra.mxu1 %v966_v52 }
0x144e   :  { %v1401_v40 = vpop.eup %1400 }
0x144f   :  { %v944_v41 = vadd.f32 1.0, %v1401_v40 }
0x1451   :  { %1402 = vrcp.f32 %v944_v41 }
0x145e   :  { %v1403_v42 = vpop.eup %1402 }
0x145f   :  { %v947_v43 = vmul.f32 2.0, %v1403_v42  ;;  %v949_v47 = vmul.f32 %v1403_v42, %v858_v31 }
0x1461   :  { %v1161_v44 = vadd.f32 -1.0, %v947_v43 }
0x1463   :  { %951 = vrot.lane.b32.xlu0 %v1161_v44, %s1408_s1 }
0x14d5   :  { %v952_v45 = vpop.permute.xlu0 %951 }
0x14d6   :  { %v954_v46 = vmul.f32 %v1403_v42, %v952_v45 }
0x14d8   :  { %956 = vrot.lane.b32.xlu1 %v954_v46, %s1409_s30 }
0x154a   :  { %v957_v48 = vpop.permute.xlu1 %956 }
0x154b   :  { %v959_v49 = vadd.f32 %v957_v48, %v949_v47 }
0x154d   :  { %1404 = vtanh.f32 %v959_v49 }
0x155a   :  { %v1405_v53 = vpop.eup %1404 }
0x155b   :  { %962 = vrot.lane.b32.xlu0 %v1405_v53, %s1408_s1 }
0x15cd   :  { %v963_v54 = vpop.permute.xlu0 %962 }
0x15ce   :  { %v965_v55 = vmul.f32 %v1403_v42, %v963_v54 }
0x15d0   :  { %1045 = vrot.lane.b32.xlu1 %v965_v55, %s1409_s30 }
0x1642   :  { %v1046_v57 = vpop.permute.xlu1 %1045 }
0x1643   :  { %1352 = vmatmul.mubr.msk.f32.vlgmr.msra.gmra.mxu1 %vm159_vm2, %v1046_v57 }
0x1703   :  { %v1115_v2 = vpop.f32.mrf.mxu1 }
0x1704   :  { %v1116_v61 = vadd.f32 %v1115_v2, %v1637_v21 }
0x1705   :  { %v1353_v0 = vpop.f32.mrf.mxu1 }
0x1706   :  { %v1124_v62 = vadd.f32 %v1164_v60, %v1116_v61 }
0x1708   :  { %1126 = vst.msk [vmem:[%s1677_s3] sm:$0xff] %vm1125_vm3, %v1124_v62 }

</bundles_post_ra>
